<compile_context>
chip_gen: v5e
topology: v5e:2x2
jax: 0.10.0
libtpu: 0.0.40
codegen_flags: <defaults>
</compile_context>

<pallas_src>
import functools

import jax
import jax.numpy as jnp
from jax.experimental import pallas as pl
from jax.experimental.pallas import tpu as pltpu

EPS = 1e-5


def _cbr_kernel(x_ref, top_ref, bot_ref, w_ref, shift_ref, o_ref, *scratch, fold_kh):
    # x_ref:     (1, TH, W, Cin)       bf16  body rows of the (unpadded) NHWC input
    # top_ref:   (1, 1, W, Cin)        bf16  row above the tile (clamped; zeroed at r==0)
    # bot_ref:   (1, 1, W, Cin)        bf16  row below the tile (clamped; zeroed at r==R-1)
    # w_ref:     (9*Cin, Cout_pad)     bf16  if fold_kh else (3, 3*Cin, Cout_pad)
    # shift_ref: (1, Cout_pad)         f32   BN shift (beta - mean*scale), zero padded
    # o_ref:     (1, TH, W, Cout_pad)  bf16
    # scratch:   [(TH*W, Cout_pad) f32] only when not fold_kh
    TH = x_ref.shape[1]
    W = x_ref.shape[2]
    Cin = x_ref.shape[3]
    Cout_pad = o_ref.shape[3]

    r = pl.program_id(1)
    R = pl.num_programs(1)

    # H padding (conv padding=1): the halo rows are clamped duplicates at the image
    # boundary, so zero them there.
    top = top_ref[0]
    bot = bot_ref[0]
    top = top * jnp.where(r == 0, 0.0, 1.0).astype(top.dtype)
    bot = bot * jnp.where(r == R - 1, 0.0, 1.0).astype(bot.dtype)
    x = jnp.concatenate([top, x_ref[0], bot], axis=0)              # (TH+2, W, Cin)

    # W padding (conv padding=1) + kw packing: lanes = [kw=0 | kw=1 | kw=2] x Cin.
    zc = jnp.zeros((TH + 2, 1, Cin), x.dtype)
    x_l = jnp.concatenate([zc, x[:, :W - 1, :]], axis=1)           # input col w-1 (0 at w=0)
    x_r = jnp.concatenate([x[:, 1:, :], zc], axis=1)               # input col w+1 (0 at w=W-1)
    xw = jnp.concatenate([x_l, x, x_r], axis=-1)                   # (TH+2, W, 3*Cin)

    if fold_kh:
        # Thin layer: fold kh into the contraction too -> one MXU push, K = 9*Cin.
        patch = jnp.concatenate([xw[0:TH], xw[1:TH + 1], xw[2:TH + 2]], axis=-1)
        acc = jnp.dot(patch.reshape(TH * W, 9 * Cin), w_ref[...],
                      preferred_element_type=jnp.float32)
    else:
        # Wide layer: 3 MXU pushes with K = 3*Cin, accumulated in an f32 VMEM scratch.
        acc_ref, = scratch
        acc_ref[...] = jnp.dot(xw[0:TH].reshape(TH * W, 3 * Cin), w_ref[0],
                               preferred_element_type=jnp.float32)
        for kh in (1, 2):
            acc_ref[...] += jnp.dot(xw[kh:kh + TH].reshape(TH * W, 3 * Cin), w_ref[kh],
                                    preferred_element_type=jnp.float32)
        acc = acc_ref[...]

    # Fused BatchNorm shift + ReLU in f32; lane-dense bf16 store.
    y = jnp.maximum(acc + shift_ref[...], 0.0)
    o_ref[...] = y.reshape(1, TH, W, Cout_pad).astype(o_ref.dtype)


def _round_up(x, m):
    return (x + m - 1) // m * m


def _vmem_limits():
    """(vmem_limit_bytes, per-tile working-set budget) for the current TPU generation."""
    cap = 64 * 1024 * 1024                     # conservative fallback (v7x physical VMEM)
    try:
        cap = int(pltpu.get_tpu_info().vmem_capacity_bytes)
    except Exception:
        pass
    limit = min(int(cap * 0.75), 96 * 1024 * 1024)   # ~96 MiB on v5e/v6e, ~48 MiB on v7x
    budget = int(limit * 0.70)                       # headroom for Mosaic internal scratch
    return limit, budget


def _tile_vmem_bytes(th, W, Cin, Cout_pad, fold_kh):
    body = th * W * Cin * 2                          # bf16 body tile
    halo = 2 * W * Cin * 2                           # bf16 halo rows
    out = th * W * Cout_pad * 2                      # bf16 output tile
    streamed = 2 * (body + halo + out)               # double-buffered by the pipeline
    const = 2 * (9 * Cin * Cout_pad * 2 + Cout_pad * 4)   # weights + shift (2 buffers)
    patch = (th + 2) * W * 3 * Cin * 2               # kw-packed bf16 patch
    if fold_kh:
        patch += th * W * 9 * Cin * 2                # kh-folded patch
    acc = th * W * Cout_pad * 4                      # f32 accumulator
    epi = th * W * Cout_pad * 4                      # f32 epilogue temporaries
    return streamed + const + 2 * patch + acc + epi


def _choose_tile_h(N, H, W, Cin, Cout_pad, fold_kh, budget, min_steps=8):
    divisors = [d for d in range(1, H + 1) if H % d == 0]
    fitting = [d for d in divisors
               if _tile_vmem_bytes(d, W, Cin, Cout_pad, fold_kh) <= budget]
    if not fitting:
        return 1
    # Keep enough grid steps to feed both v7x TensorCores and the DMA pipeline.
    balanced = [d for d in fitting if N * (H // d) >= min_steps]
    return max(balanced) if balanced else max(fitting)


def cbr_forward_nhwc(x_nhwc, w_oihw, gamma, beta, running_mean, running_var,
                     eps=EPS, tile_h=None):
    """NHWC-native CBR (inference BatchNorm folded). Returns (N, H, W, Cout) bf16."""
    N, H, W, Cin = x_nhwc.shape
    Cout = w_oihw.shape[0]
    Cout_pad = max(128, _round_up(Cout, 128))        # lane-dense, unmasked stores
    fold_kh = Cin <= 128                             # thin layers: single MXU push

    vmem_limit, budget = _vmem_limits()
    if tile_h is None:
        tile_h = _choose_tile_h(N, H, W, Cin, Cout_pad, fold_kh, budget)
    assert H % tile_h == 0, "tile_h must divide H"
    R = H // tile_h

    # Fold inference BatchNorm: scale into the weights, shift added in the epilogue.
    scale = gamma / jnp.sqrt(running_var + eps)
    shift = beta - running_mean * scale
    w_hwio = jnp.transpose(w_oihw, (2, 3, 1, 0)) * scale             # (3, 3, Cin, Cout)
    w_hwio = jnp.pad(w_hwio, ((0, 0), (0, 0), (0, 0), (0, Cout_pad - Cout)))
    if fold_kh:
        w_packed = w_hwio.reshape(9 * Cin, Cout_pad).astype(jnp.bfloat16)
        w_spec = pl.BlockSpec((9 * Cin, Cout_pad), lambda n, r: (0, 0))
        scratch_shapes = []
    else:
        w_packed = w_hwio.reshape(3, 3 * Cin, Cout_pad).astype(jnp.bfloat16)
        w_spec = pl.BlockSpec((3, 3 * Cin, Cout_pad), lambda n, r: (0, 0, 0))
        scratch_shapes = [pltpu.VMEM((tile_h * W, Cout_pad), jnp.float32)]
    shift_p = jnp.pad(shift, (0, Cout_pad - Cout)).reshape(1, Cout_pad).astype(jnp.float32)

    xb = x_nhwc.astype(jnp.bfloat16)

    out = pl.pallas_call(
        functools.partial(_cbr_kernel, fold_kh=fold_kh),
        out_shape=jax.ShapeDtypeStruct((N, H, W, Cout_pad), jnp.bfloat16),
        grid_spec=pltpu.PrefetchScalarGridSpec(
            num_scalar_prefetch=0,
            grid=(N, R),
            in_specs=[
                pl.BlockSpec((1, tile_h, W, Cin), lambda n, r: (n, r, 0, 0)),
                # Halo rows read straight from the unpadded activation; index clamped at
                # the image boundary (zeroed in-kernel), so no wrapper pad/gather pass.
                pl.BlockSpec((1, 1, W, Cin),
                             lambda n, r: (n, jnp.maximum(r * tile_h - 1, 0), 0, 0)),
                pl.BlockSpec((1, 1, W, Cin),
                             lambda n, r: (n, jnp.minimum((r + 1) * tile_h, H - 1), 0, 0)),
                # TODO(synk): mark the two constant operands single-buffered
                # (pipeline_mode=pl.Buffered(1)) to reclaim one weight buffer of VMEM.
                w_spec,
                pl.BlockSpec((1, Cout_pad), lambda n, r: (0, 0)),
            ],
            out_specs=pl.BlockSpec((1, tile_h, W, Cout_pad), lambda n, r: (n, r, 0, 0)),
            scratch_shapes=scratch_shapes,
        ),
        compiler_params=pltpu.CompilerParams(
            dimension_semantics=("parallel", "parallel"),
            vmem_limit_bytes=vmem_limit,
        ),
    )(xb, xb, xb, w_packed, shift_p)

    # Drop the lane padding; an NHWC network with 128-multiple channels would skip this.
    return out[..., :Cout]


def cbr_forward(x_nchw, w_oihw, gamma, beta, running_mean, running_var,
                eps=EPS, tile_h=None):
    """NCHW interface matching the PyTorch module. Returns (N, Cout, H, W) bf16."""
    # TODO(synk): in an end-to-end NHWC bf16 network these layout transposes disappear;
    # they exist only to preserve the PyTorch module's NCHW interface for this test.
    x_nhwc = jnp.transpose(x_nchw, (0, 2, 3, 1))
    y = cbr_forward_nhwc(x_nhwc, w_oihw, gamma, beta, running_mean, running_var,
                         eps=eps, tile_h=tile_h)
    return jnp.transpose(y, (0, 3, 1, 2))


def _reference(x_nchw, w_oihw, gamma, beta, running_mean, running_var, eps=EPS):
    # Mirrors the kernel's numerics: BN scale folded into bf16 weights, bf16 inputs,
    # f32 accumulation, f32 shift + ReLU epilogue, bf16 output.
    scale = gamma / jnp.sqrt(running_var + eps)
    shift = beta - running_mean * scale
    wq = (w_oihw * scale[:, None, None, None]).astype(jnp.bfloat16).astype(jnp.float32)
    xq = x_nchw.astype(jnp.bfloat16).astype(jnp.float32)
    y = jax.lax.conv_general_dilated(
        xq, wq, window_strides=(1, 1), padding=((1, 1), (1, 1)),
        dimension_numbers=("NCHW", "OIHW", "NCHW"),
        precision=jax.lax.Precision.HIGHEST)
    y = jnp.maximum(y + shift[None, :, None, None], 0.0)
    return y.astype(jnp.bfloat16).astype(jnp.float32)


if __name__ == "__main__":
    key = jax.random.PRNGKey(0)
    k_x, k_w, k_m, k_v = jax.random.split(key, 4)

    N, Cin, H, W = 2, 4, 16, 16
    Cout = 8

    x = jax.random.normal(k_x, (N, Cin, H, W), dtype=jnp.float32)

    # kaiming_normal_(mode='fan_out', nonlinearity='relu'): std = sqrt(2 / (Cout*3*3))
    fan_out = Cout * 3 * 3
    std = (2.0 / fan_out) ** 0.5
    w = jax.random.normal(k_w, (Cout, Cin, 3, 3), dtype=jnp.float32) * std

    # Module init: gamma=1, beta=0.  Non-trivial running stats exercise the BN fold.
    gamma = jnp.ones((Cout,), dtype=jnp.float32)
    beta = jnp.zeros((Cout,), dtype=jnp.float32)
    running_mean = 0.1 * jax.random.normal(k_m, (Cout,), dtype=jnp.float32)
    running_var = 1.0 + 0.2 * jax.random.uniform(k_v, (Cout,), dtype=jnp.float32)

    out = cbr_forward(x, w, gamma, beta, running_mean, running_var)
    out = jax.block_until_ready(out)

    ref = _reference(x, w, gamma, beta, running_mean, running_var)
    assert out.shape == (N, Cout, H, W)
    err = float(jnp.max(jnp.abs(out.astype(jnp.float32) - ref)))
    assert jnp.allclose(out.astype(jnp.float32), ref, atol=1e-2, rtol=1e-2), err

    print("KERNEL_OK")
</pallas_src>

<mosaic_0001>
module attributes {stable_mosaic.version = 11 : i64} {
  func.func @_cbr_kernel(%arg0: i32, %arg1: i32, %arg2: memref<1x4x16x4xbf16, #tpu.memory_space<vmem>>, %arg3: memref<1x1x16x4xbf16, #tpu.memory_space<vmem>>, %arg4: memref<1x1x16x4xbf16, #tpu.memory_space<vmem>>, %arg5: memref<36x128xbf16, #tpu.memory_space<vmem>>, %arg6: memref<1x128xf32, #tpu.memory_space<vmem>>, %arg7: memref<1x4x16x128xbf16, #tpu.memory_space<vmem>>) attributes {dimension_semantics = [#tpu.dimension_semantics<parallel>, #tpu.dimension_semantics<parallel>], iteration_bounds = array<i64: 2, 4>, scalar_prefetch = 0 : i64, scratch_operands = 0 : i64, tpu.core_type = #tpu.core_type<tc>, window_params = [{transform_indices = @transform_0, window_bounds = array<i64: 1, 4, 16, 4>}, {transform_indices = @transform_1, window_bounds = array<i64: 1, 1, 16, 4>}, {transform_indices = @transform_2, window_bounds = array<i64: 1, 1, 16, 4>}, {pipeline_mode = #tpu.pipeline_mode<synchronous>, transform_indices = @transform_3, window_bounds = array<i64: 36, 128>}, {pipeline_mode = #tpu.pipeline_mode<synchronous>, transform_indices = @transform_4, window_bounds = array<i64: 1, 128>}, {transform_indices = @transform_5, window_bounds = array<i64: 1, 4, 16, 128>}]} {
    %c0 = arith.constant 0 : index
    %c0_0 = arith.constant 0 : index
    %c0_1 = arith.constant 0 : index
    %c0_2 = arith.constant 0 : index
    %0 = vector.load %arg3[%c0, %c0_0, %c0_1, %c0_2] : memref<1x1x16x4xbf16, #tpu.memory_space<vmem>>, vector<1x1x16x4xbf16>
    %1 = vector.shape_cast %0 : vector<1x1x16x4xbf16> to vector<1x16x4xbf16>
    %c0_3 = arith.constant 0 : index
    %c0_4 = arith.constant 0 : index
    %c0_5 = arith.constant 0 : index
    %c0_6 = arith.constant 0 : index
    %2 = vector.load %arg4[%c0_3, %c0_4, %c0_5, %c0_6] : memref<1x1x16x4xbf16, #tpu.memory_space<vmem>>, vector<1x1x16x4xbf16>
    %3 = vector.shape_cast %2 : vector<1x1x16x4xbf16> to vector<1x16x4xbf16>
    %c0_i32 = arith.constant 0 : i32
    %4 = arith.cmpi eq, %arg1, %c0_i32 : i32
    %cst = arith.constant 0.000000e+00 : f32
    %cst_7 = arith.constant 1.000000e+00 : f32
    %5 = arith.select %4, %cst, %cst_7 : f32
    %6 = arith.truncf %5 : f32 to bf16
    %7 = vector.broadcast %6 : bf16 to vector<1x16x4xbf16>
    %8 = arith.mulf %1, %7 : vector<1x16x4xbf16>
    %c3_i32 = arith.constant 3 : i32
    %9 = arith.cmpi eq, %arg1, %c3_i32 : i32
    %cst_8 = arith.constant 0.000000e+00 : f32
    %cst_9 = arith.constant 1.000000e+00 : f32
    %10 = arith.select %9, %cst_8, %cst_9 : f32
    %11 = arith.truncf %10 : f32 to bf16
    %12 = vector.broadcast %11 : bf16 to vector<1x16x4xbf16>
    %13 = arith.mulf %3, %12 : vector<1x16x4xbf16>
    %c0_10 = arith.constant 0 : index
    %c0_11 = arith.constant 0 : index
    %c0_12 = arith.constant 0 : index
    %c0_13 = arith.constant 0 : index
    %14 = vector.load %arg2[%c0_10, %c0_11, %c0_12, %c0_13] : memref<1x4x16x4xbf16, #tpu.memory_space<vmem>>, vector<1x4x16x4xbf16>
    %15 = vector.shape_cast %14 : vector<1x4x16x4xbf16> to vector<4x16x4xbf16>
    %16 = tpu.concatenate %8, %15, %13 in 0 : vector<1x16x4xbf16>, vector<4x16x4xbf16>, vector<1x16x4xbf16> -> vector<6x16x4xbf16>
    %cst_14 = arith.constant 0.000000e+00 : bf16
    %17 = vector.broadcast %cst_14 : bf16 to vector<6x1x4xbf16>
    %18 = vector.extract_strided_slice %16 {offsets = [0, 0, 0], sizes = [6, 15, 4], strides = [1, 1, 1]} : vector<6x16x4xbf16> to vector<6x15x4xbf16>
    %19 = tpu.concatenate %17, %18 in 1 : vector<6x1x4xbf16>, vector<6x15x4xbf16> -> vector<6x16x4xbf16>
    %20 = vector.extract_strided_slice %16 {offsets = [0, 1, 0], sizes = [6, 15, 4], strides = [1, 1, 1]} : vector<6x16x4xbf16> to vector<6x15x4xbf16>
    %21 = tpu.concatenate %20, %17 in 1 : vector<6x15x4xbf16>, vector<6x1x4xbf16> -> vector<6x16x4xbf16>
    %22 = tpu.concatenate %19, %16, %21 in 2 : vector<6x16x4xbf16>, vector<6x16x4xbf16>, vector<6x16x4xbf16> -> vector<6x16x12xbf16>
    %23 = vector.extract_strided_slice %22 {offsets = [0, 0, 0], sizes = [4, 16, 12], strides = [1, 1, 1]} : vector<6x16x12xbf16> to vector<4x16x12xbf16>
    %24 = vector.extract_strided_slice %22 {offsets = [1, 0, 0], sizes = [4, 16, 12], strides = [1, 1, 1]} : vector<6x16x12xbf16> to vector<4x16x12xbf16>
    %25 = vector.extract_strided_slice %22 {offsets = [2, 0, 0], sizes = [4, 16, 12], strides = [1, 1, 1]} : vector<6x16x12xbf16> to vector<4x16x12xbf16>
    %26 = tpu.concatenate %23, %24, %25 in 2 : vector<4x16x12xbf16>, vector<4x16x12xbf16>, vector<4x16x12xbf16> -> vector<4x16x36xbf16>
    %27 = vector.shape_cast %26 : vector<4x16x36xbf16> to vector<64x36xbf16>
    %c0_15 = arith.constant 0 : index
    %c0_16 = arith.constant 0 : index
    %28 = vector.load %arg5[%c0_15, %c0_16] : memref<36x128xbf16, #tpu.memory_space<vmem>>, vector<36x128xbf16>
    %cst_17 = arith.constant dense<0.000000e+00> : vector<64x128xf32>
    %29 = tpu.matmul %27, %28, %cst_17 {dimension_numbers = #tpu.dot_dimension_numbers<[1], [0], [0], [1], [0, 0, 1, 1], [], []>} : vector<64x36xbf16>, vector<36x128xbf16>, vector<64x128xf32> -> vector<64x128xf32>
    %c0_18 = arith.constant 0 : index
    %c0_19 = arith.constant 0 : index
    %30 = vector.load %arg6[%c0_18, %c0_19] : memref<1x128xf32, #tpu.memory_space<vmem>>, vector<1x128xf32>
    %31 = vector.broadcast %30 : vector<1x128xf32> to vector<64x128xf32>
    %32 = arith.addf %29, %31 : vector<64x128xf32>
    %cst_20 = arith.constant 0.000000e+00 : f32
    %33 = vector.broadcast %cst_20 : f32 to vector<64x128xf32>
    %34 = arith.maximumf %32, %33 : vector<64x128xf32>
    %35 = vector.shape_cast %34 : vector<64x128xf32> to vector<1x4x16x128xf32>
    %36 = arith.truncf %35 : vector<1x4x16x128xf32> to vector<1x4x16x128xbf16>
    %c0_21 = arith.constant 0 : index
    %c0_22 = arith.constant 0 : index
    %c0_23 = arith.constant 0 : index
    %c0_24 = arith.constant 0 : index
    %37 = vector.load %arg7[%c0_21, %c0_22, %c0_23, %c0_24] : memref<1x4x16x128xbf16, #tpu.memory_space<vmem>>, vector<1x4x16x128xbf16>
    tpu.vector_store %arg7[%c0_21, %c0_22, %c0_23, %c0_24], %36 {strides = array<i32>} : memref<1x4x16x128xbf16, #tpu.memory_space<vmem>>, vector<1x4x16x128xbf16>,
    return
  }
  func.func @transform_0(%arg0: i32, %arg1: i32) -> (i32, i32, i32, i32) {
    %c0_i32 = arith.constant 0 : i32
    %c0_i32_0 = arith.constant 0 : i32
    %c0_i32_1 = arith.constant 0 : i32
    return %arg0, %arg1, %c0_i32, %c0_i32_0 : i32, i32, i32, i32
  }
  func.func @transform_1(%arg0: i32, %arg1: i32) -> (i32, i32, i32, i32) {
    %c4_i32 = arith.constant 4 : i32
    %0 = arith.muli %arg1, %c4_i32 : i32
    %c1_i32 = arith.constant 1 : i32
    %1 = arith.subi %0, %c1_i32 : i32
    %c0_i32 = arith.constant 0 : i32
    %2 = arith.maxsi %1, %c0_i32 : i32
    %c0_i32_0 = arith.constant 0 : i32
    %c0_i32_1 = arith.constant 0 : i32
    %c0_i32_2 = arith.constant 0 : i32
    return %arg0, %2, %c0_i32_0, %c0_i32_1 : i32, i32, i32, i32
  }
  func.func @transform_2(%arg0: i32, %arg1: i32) -> (i32, i32, i32, i32) {
    %c1_i32 = arith.constant 1 : i32
    %0 = arith.addi %arg1, %c1_i32 : i32
    %c4_i32 = arith.constant 4 : i32
    %1 = arith.muli %0, %c4_i32 : i32
    %c15_i32 = arith.constant 15 : i32
    %2 = arith.minsi %1, %c15_i32 : i32
    %c0_i32 = arith.constant 0 : i32
    %c0_i32_0 = arith.constant 0 : i32
    %c0_i32_1 = arith.constant 0 : i32
    return %arg0, %2, %c0_i32, %c0_i32_0 : i32, i32, i32, i32
  }
  func.func @transform_3(%arg0: i32, %arg1: i32) -> (i32, i32) {
    %c0_i32 = arith.constant 0 : i32
    %c0_i32_0 = arith.constant 0 : i32
    %c0_i32_1 = arith.constant 0 : i32
    return %c0_i32, %c0_i32_0 : i32, i32
  }
  func.func @transform_4(%arg0: i32, %arg1: i32) -> (i32, i32) {
    %c0_i32 = arith.constant 0 : i32
    %c0_i32_0 = arith.constant 0 : i32
    %c0_i32_1 = arith.constant 0 : i32
    return %c0_i32, %c0_i32_0 : i32, i32
  }
  func.func @transform_5(%arg0: i32, %arg1: i32) -> (i32, i32, i32, i32) {
    %c0_i32 = arith.constant 0 : i32
    %c0_i32_0 = arith.constant 0 : i32
    %c0_i32_1 = arith.constant 0 : i32
    return %arg0, %arg1, %c0_i32, %c0_i32_0 : i32, i32, i32, i32
  }
}

</mosaic_0001>

<bundles_post_ra>
// kernel: tpu_custom_call.1
= control target key start
LH: loop header
LB: loop body
LE: loop exit
PB: predicated region body
PF: predicated region fallthrough
CT: control target
= control target key end

     0   :  { %s1539_s0 = inlined_call_operand.vmem [shape: bf16[2,16,16,4], index: 0, kind: input, shape index: {}]   ;;  %s1540_s1 = inlined_call_operand.vmem [shape: bf16[2,16,16,4], index: 1, kind: input, shape index: {}]   ;;  %s1541_s2 = inlined_call_operand.vmem [shape: bf16[2,16,16,4], index: 2, kind: input, shape index: {}]   ;;  %s1542_s3 = inlined_call_operand.vmem [shape: bf16[36,128], index: 3, kind: input, shape index: {}]   ;;  %s1543_s4 = inlined_call_operand.vmem [shape: f32[1,128], index: 4, kind: input, shape index: {}]   ;;  %s1544_s5 = inlined_call_operand.hbm [shape: bf16[2,16,16,128], index: 5, kind: output, shape index: {}]  }
   0x1   :  { %1549 = sst [smem:[#allocation7_spill]] %s1539_s0 }
   0x2   :  { %1550 = sst [smem:[#allocation8_spill]] %s1541_s2 }
   0x3   :  { %10 = vsyncpa [#allocation3], 0 }
   0x4   :  { %12 = vsyncpa [#allocation3 + $0x1], 0  ;;  %s1222_s18 = smov 0   ;;  %s1224_s19 = smov 0  }
   0x5   :  { %s1226_s20 = smov 0   ;;  %s1228_s21 = smov 0  }
   0x6   :  { %s1230_s22 = smov 0   ;;  %s1232_s23 = smov 0  }
   0x7   :  { %s1234_s24 = smov 0   ;;  %s1236_s25 = smov 0  }
   0x8 LB: > { %s891_s26 = sadd.s32 4294967295, %s1185_s25   ;;  %s892_s27 = sadd.s32 4294967294, %s1185_s25   ;;  %s1185_s25 = sphi %s1236_s25, %s18_s25   ;;  %s1181_s24 = sphi %s1234_s24, %s1571_s24   ;;  %s1177_s23 = sphi %s1232_s23, %s1570_s23   ;;  %s1173_s22 = sphi %s1230_s22, %s1569_s22   ;;  %s1169_s21 = sphi %s1228_s21, %s1568_s21   ;;  %s1165_s20 = sphi %s1226_s20, %s1567_s20   ;;  %s1161_s19 = sphi %s1224_s19, %s1566_s19   ;;  %s1157_s18 = sphi %s1222_s18, %s1565_s18  }
   0x9   : > { %s27_s28 = sadd.s32 1, %s1177_s23  ;;  %s30_s29 = sadd.s32 1, %s1181_s24 }
   0xa   : > { %p28_p0 = scmp.ge.s32.totalorder %s27_s28, 4  ;;  %p191_p1 = scmp.ne.s32.totalorder %s1165_s20, %s1161_s19 }
   0xb   : > { %p192_p2 = scmp.eq.s32.totalorder %s891_s26, 7  ;;  %p197_p5 = scmp.ne.s32.totalorder %s1161_s19, %s1157_s18 }
   0xc   : > { %s1573_s28 = smov (%p28_p0, %s27_s28), 0  ;;  %s1575_s29 = smov (!%p28_p0, %s30_s29), %s1181_s24 }
   0xd   : > { %1551 = sst [smem:[#allocation5_spill]] %s1573_s28  ;;  %s177_s30 = ssub.s32 %s1177_s23, %s1573_s28 }
   0xe   : > { %p1273_p3 = por %p192_p2, %p191_p1  ;;  %p32_p4 = scmp.ge.s32.totalorder %s1575_s29, 2 }
   0xf   : > { %p198_p6 = scmp.eq.s32.totalorder %s892_s27, 7  ;;  %p901_p7 = scmp.ge.s32.totalorder %s1185_s25, 1 }
  0x10   : > { %s1577_s29 = smov (%p32_p4, %s1575_s29), 0  ;;  %p276_p9 = scmp.lt.s32.totalorder %s1185_s25, 9 }
  0x11   : > { %1553 = sst [smem:[#allocation6_spill]] %s1577_s29  ;;  %p1282_p8 = por %p198_p6, %p197_p5 }
  0x12   : > { %s176_s8 = ssub.s32 %s1181_s24, %s1577_s29  ;;  %s181_s9 = sadd.s32 1, %s1165_s20 }
  0x13   : > { %s178_s10 = sor.u32 %s177_s30, %s176_s8  ;;  %p277_p10 = pnand %p901_p7, %p276_p9 }
  0x14   : > { %p179_p11 = scmp.eq.s32.totalorder %s178_s10, 0  ;;  %s903_s12 = sshll.u32 (!%p277_p10), %s1169_s21, 2 }
  0x15   : > { %280 = sbr.rel (%p277_p10) target bundleno = 443 (0x1bb), region = 40  ;;  %p336_p12 = scmp.lt.s32.totalorder (!%p277_p10), %s1173_s22, 1 }
  0x16   : > { %s1291_s11 = scalar_select %p179_p11, %s1165_s20, %s181_s9  }
  0x17   : > { %p338_p13 = scmp.lt.s32.totalorder (!%p277_p10), %s903_s12, 15  ;;  %s966_s17 = sadd.s32 (!%p277_p10), 4, %s903_s12 }
  0x18   : > { %p1299_p0 = scmp.lt.s32.totalorder (!%p277_p10), %s966_s17, 15  ;;  %p409_p1 = scmp.eq.s32.totalorder (!%p277_p10), %s1169_s21, 3 }
  0x19   : > { %s1556_s0 = sld [smem:[#allocation7_spill]] (!%p277_p10)  ;;  %p386_p6 = scmp.eq.s32.totalorder (!%p277_p10), %s1169_s21, 0 }
  0x1a   : > { %s337_s13 = scalar_select %p336_p12, %s1173_s22, 1  ;;  %vm545_vm0 = vcmask 1047552   ;;  %vm546_vm1 = vsmask.f32 7424  ;;  %vm518_vm3 = vcmask 1040384   ;;  %vm584_vm6 = vcmask 31744  }
  0x1b   : > { %s339_s14 = scalar_select %p338_p13, %s903_s12, 15  ;;  %vm1333_vm2 = vmand %vm545_vm0, %vm546_vm1  ;;  %vm519_vm4 = vsmask.f32 256  ;;  %vm603_vm7 = vcmask 64512   ;;  %vm688_vm8 = vcmask 1041408   ;;  %vm637_vm9 = vcmask 97280  }
  0x1c   : > { %s1296_s15 = sshll.u32 %s337_s13, 5  ;;  %s1309_s13 = sadd.s32 4294967295, %s903_s12  ;;  %vm1414_vm5 = vmand %vm518_vm3, %vm519_vm4  ;;  %vm646_vm10 = vcmask 195584   ;;  %vm679_vm11 = vcmask 293888  }
  0x1d   : > { %s904_s16 = sshll.u32 %s339_s14, 1  ;;  %s1579_s17 = smov (!%p1299_p0, %s966_s17), 15 }
  0x1e   : > { %s342_s26 = sadd.s32 %s1296_s15, %s904_s16  ;;  %s1545_s16 = smov 4  }
  0x1f   : > { %s906_s30 = sshll.u32 %s342_s26, 2  ;;  %s1581_s17 = smov (!%p1299_p0, %s1579_s17), 15 }
  0x20   : > { %s1307_s10 = scalar_lea.vmem %s1556_s0, %s906_s30  ;;  %s921_s26 = sshll.u32 %s1581_s17, 1 }
  0x21   : > { %v1312_v0 = vld [vmem:[%s1307_s10 + $0x10] sm:$0xff]  ;;  %v1315_v1 = vld [vmem:[%s1307_s10 + $0x18] sm:$0xff]  ;;  %s410_s14 = scalar_select %p409_p1, 0.0, 1.0  ;;  %v1346_v11 = vld [vmem:[%s1307_s10 + $0x8] sm:$0xff] }
  0x22   : > { %560 = vrot.lane.b32.xlu0 %v1312_v0, %s1545_s16  ;;  %v492_v2 = vshrl.u32 %v1312_v0, 16  ;;  %v495_v3 = vshll.u32 %v1312_v0, 16  ;;  %v499_v4 = vshrl.u32 %v1315_v1, 16  ;;  %v502_v5 = vshll.u32 %v1315_v1, 16  ;;  %s373_s27 = sadd.s32 %s921_s26, %s1296_s15  ;;  %s1559_s2 = sld [smem:[#allocation8_spill]]  ;;  %v1362_v20 = vld [vmem:[%s1307_s10] sm:$0xff] }
  0x23   : > { %p412_p2 = scmp.ne.f32.partialorder %s410_s14, %s410_s14  ;;  %s413_s12 = sshrl.u32 %s410_s14, 16  ;;  %v488_v15 = vshll.u32 %v1346_v11, 16  ;;  %v485_v21 = vshrl.u32 %v1346_v11, 16  ;;  %v481_v34 = vshll.u32 %v1362_v20, 16  ;;  %v478_v37 = vshrl.u32 %v1362_v20, 16 }
  0x24   : > { %v533_v6 = vrot.slane %v495_v3, 1  ;;  %s414_s30 = sand.u32 1, %s413_s12  ;;  %v535_v7 = vrot.slane %v502_v5, 1  ;;  %s923_s9 = sshll.u32 %s373_s27, 2  ;;  %v494_v60 = vrot.slane %v492_v2, 7  ;;  %v501_v61 = vrot.slane %v499_v4, 7 }
  0x25   : > { %s415_s8 = sadd.s32 32767, %s414_s30  ;;  %s1188_s26 = smov 8   ;;  %v531_v22 = vrot.slane %v488_v15, 1  ;;  %v529_v38 = vrot.slane %v481_v34, 1 }
  0x26   : > { %v534_v9 = vor.u32 %v533_v6, %v492_v2  ;;  %s416_s16 = sadd.s32 %s415_s8, %s410_s14  ;;  %v536_v10 = vor.u32 %v535_v7, %v499_v4  ;;  %p348_p4 = scmp.gt.s32.totalorder %s1309_s13, 0  ;;  %v497_v6 = vor.u32 %v495_v3, %v494_v60  ;;  %v504_v8 = vor.u32 %v502_v5, %v501_v61  ;;  %v1090_v61 = vld [vmem:[%s1543_s4] ss:$0 sm:$0xff] }
  0x27   : > { %s417_s29 = sand.u32 4294901760, %s416_s16  ;;  %s1560_s16 = smov 4   ;;  %v532_v27 = vor.u32 %v531_v22, %v485_v21  ;;  %v530_v40 = vor.u32 %v529_v38, %v478_v37 }
  0x28   : > { %s375_s0 = scalar_lea.vmem %s1559_s2, %s923_s9  ;;  %v551_v12 = vsel %vm1333_vm2, %v534_v9, 0  ;;  %s1583_s29 = smov (%p412_p2, %s417_s29), 2143289344  ;;  %v552_v13 = vsel %vm1333_vm2, %v536_v10, 0  ;;  %v524_v2 = vsel %vm1414_vm5, 0, %v497_v6  ;;  %v525_v0 = vsel %vm1414_vm5, 0, %v504_v8 }
  0x29   : > { %578 = vrot.lane.b32.xlu1 %v551_v12, %s1188_s26  ;;  %v979_v14 = vld [vmem:[%s375_s0] sm:$0xff]   ;;  %580 = vrot.lane.b32.xlu2 %v552_v13, %s1188_s26  ;;  %s420_s30 = sshrl.u32 %s1583_s29, 16  ;;  %p909_p5 = scmp.lt.s32.totalorder %s1309_s13, 15  ;;  %v550_v31 = vsel %vm1333_vm2, %v532_v27, 0  ;;  %v549_v41 = vsel %vm1333_vm2, %v530_v40, 0  ;;  %v480_v12 = vrot.slane %v478_v37, 7 }
  0x2a   : > { %562 = vrot.lane.b32.xlu0 %v1315_v1, %s1560_s16  ;;  %s421_s27 = sshll.u32 %s420_s30, 16  ;;  %v980_v16 = vunpack.c.l.bf16 %v979_v14  ;;  %v981_v17 = vunpack.c.h.bf16 %v979_v14  ;;  %s1585_s13 = smov (!%p348_p4, %s1309_s13), 0  ;;  %v972_v40 = vld [vmem:[%s1542_s3 + $0x8] sm:$0xff] }
  0x2b   : > { %s422_s14 = sor.u32 %s421_s27, %s420_s30  ;;  %s1587_s13 = smov (!%p909_p5, %s1585_s13), 15 }
  0x2c   : > { %v423_v18 = vstv %s422_s14  ;;  %s914_s0 = sshll.u32 %s1587_s13, 1  ;;  %s973_s14 = sshll.u32 %s1169_s21, 3 }
  0x2d   : > { %v427_v19 = vunpack.c.l.bf16 %v423_v18  ;;  %s1370_s29 = sadd.s32 %s914_s0, %s1296_s15  ;;  %s955_s0 = sshll.u32 %s1173_s22, 5 }
  0x2e   : > { %s387_s15 = scalar_select %p386_p6, 0.0, 1.0 }
  0x2f   : > { %v428_v23 = vmul.f32 %v980_v16, %v427_v19  ;;  %v429_v24 = vmul.f32 %v981_v17, %v427_v19  ;;  %s916_s30 = sshll.u32 %s1370_s29, 2  ;;  %v483_v17 = vor.u32 %v481_v34, %v480_v12 }
  0x30   : > { %s390_s10 = sshrl.u32 %s387_s15, 16  ;;  %p389_p7 = scmp.ne.f32.partialorder %s387_s15, %s387_s15 }
  0x31   : > { %v430_v25 = vpack.c.bf16 %v428_v23, %v428_v23  ;;  %v431_v26 = vpack.c.bf16 %v429_v24, %v429_v24  ;;  %s391_s13 = sand.u32 1, %s390_s10  ;;  %s358_s2 = scalar_lea.vmem %s1540_s1, %s916_s30  ;;  %v522_v19 = vsel %vm1414_vm5, 0, %v483_v17 }
  0x32   : > { %556 = vrot.lane.b32.xlu0 %v1362_v20, %s1560_s16  ;;  %s392_s8 = sadd.s32 32767, %s391_s13  ;;  %v975_v42 = vld [vmem:[%s358_s2] sm:$0xff]   ;;  %s1189_s2 = smov 12   ;;  %v487_v20 = vrot.slane %v485_v21, 7 }
  0x33   : > { %v462_v28 = vunpack.c.l.b16 %v430_v25  ;;  %v463_v29 = vunpack.c.l.b16 %v431_v26  ;;  %s393_s9 = sadd.s32 %s392_s8, %s387_s15  ;;  %v976_v44 = vunpack.c.l.bf16 %v975_v42  ;;  %v977_v45 = vunpack.c.h.bf16 %v975_v42 }
  0x34   : > { %s394_s17 = sand.u32 4294901760, %s393_s9 }
  0x35   : > { %v1374_v30 = vpack.c.b16 %v463_v29, %v462_v28  ;;  %s1589_s17 = smov (%p389_p7, %s394_s17), 2143289344 }
  0x36   : > { %s397_s12 = sshrl.u32 %s1589_s17, 16 }
  0x37   : > { %564 = vrot.lane.b32.xlu1 %v1374_v30, %s1560_s16  ;;  %v506_v32 = vshrl.u32 %v1374_v30, 16  ;;  %v509_v33 = vshll.u32 %v1374_v30, 16  ;;  %s398_s27 = sshll.u32 %s397_s12, 16 }
  0x38   : > { %s399_s28 = sor.u32 %s398_s27, %s397_s12  ;;  %s332_s12 = sand.u32 1, %s1161_s19  }
  0x39   : > { %v537_v35 = vrot.slane %v509_v33, 1  ;;  %v400_v43 = vstv %s399_s28  ;;  %s1190_s28 = smov 24   ;;  %v508_v18 = vrot.slane %v506_v32, 7  ;;  %s902_s30 = sshll.u32 %s332_s12, 5 }
  0x3a   : > { %576 = vrot.lane.b32.xlu0 %v550_v31, %s1188_s26  ;;  %v404_v46 = vunpack.c.l.bf16 %v400_v43  ;;  %v490_v31 = vor.u32 %v488_v15, %v487_v20  ;;  %v659_v15 = vld [vmem:[%s1542_s3 + $0x10] sm:$0x3]  ;;  %s1486_s27 = scalar_lea.vmem [#allocation2], %s902_s30  ;;  %s746_s10 = scalar_lea.sflag [#allocation3], %s332_s12 }
  0x3b   : > { %v538_v36 = vor.u32 %v537_v35, %v506_v32  ;;  %v511_v23 = vor.u32 %v509_v33, %v508_v18  ;;  %v673_v37 = vunpack.c.l.b16 %v659_v15  ;;  %s761_s21 = sshll.u32 %s1486_s27, 4  ;;  %s1111_s30 = scalar_lea.hbm %s1544_s5, 256  ;;  %s762_s21 = int_to_ptr.vmem [resolvable:$true] %s761_s21 }
  0x3c   : > { %v405_v47 = vmul.f32 %v976_v44, %v404_v46  ;;  %v406_v48 = vmul.f32 %v977_v45, %v404_v46  ;;  %v523_v32 = vsel %vm1414_vm5, 0, %v490_v31 }
  0x3d   : > { %v553_v39 = vsel %vm1333_vm2, %v538_v36, 0  ;;  %v526_v27 = vsel %vm1414_vm5, 0, %v511_v23  ;;  %v676_v38 = vpack.c.b16 %v673_v37, %v673_v37 }
  0x3e   : > { %582 = vrot.lane.b32.xlu2 %v553_v39, %s1188_s26  ;;  %v407_v49 = vpack.c.bf16 %v405_v47, %v405_v47  ;;  %v408_v50 = vpack.c.bf16 %v406_v48, %v406_v48 }
  0x3f   : > { %558 = vrot.lane.b32.xlu1 %v1346_v11, %s1560_s16  ;;  %v690_v39 = vsel %vm688_vm8, %v676_v38, 0 }
  0x40   : > { %v452_v51 = vunpack.c.l.b16 %v407_v49  ;;  %v453_v52 = vunpack.c.l.b16 %v408_v50  ;;  %1006 = vmatpush.bf16.msra.mxu2 %v690_v39  ;;  %697 = vmatpush.bf16.msra.mxu0 %v690_v39 }
  0x41   : > { %1007 = vmatpush.bf16.msra.mxu3 %v690_v39  ;;  %1005 = vmatpush.bf16.msra.mxu1 %v690_v39 }
  0x42   : > { %v464_v53 = vpack.c.b16 %v453_v52, %v452_v51 }
  0x44   : > { %v471_v54 = vshrl.u32 %v464_v53, 16  ;;  %v474_v55 = vshll.u32 %v464_v53, 16  ;;  %1009 = vmatpush.bf16.msra.mxu2 %v972_v40  ;;  %698 = vmatpush.bf16.msra.mxu0 %v972_v40 }
  0x45   : > { %1010 = vmatpush.bf16.msra.mxu3 %v972_v40  ;;  %1008 = vmatpush.bf16.msra.mxu1 %v972_v40 }
  0x46   : > { %574 = vrot.lane.b32.xlu2 %v549_v41, %s1188_s26  ;;  %v527_v56 = vrot.slane %v474_v55, 1  ;;  %v473_v62 = vrot.slane %v471_v54, 7  ;;  %v971_v41 = vld [vmem:[%s1542_s3] sm:$0xff] }
  0x48   : > { %v528_v57 = vor.u32 %v527_v56, %v471_v54  ;;  %v476_v9 = vor.u32 %v474_v55, %v473_v62  ;;  %1012 = vmatpush.bf16.msra.mxu2 %v971_v41  ;;  %699 = vmatpush.bf16.msra.mxu0 %v971_v41 }
  0x49   : > { %1013 = vmatpush.bf16.msra.mxu3 %v971_v41  ;;  %1011 = vmatpush.bf16.msra.mxu1 %v971_v41 }
  0x4a   : > { %v548_v58 = vsel %vm1333_vm2, %v528_v57, 0  ;;  %v521_v10 = vsel %vm1414_vm5, 0, %v476_v9 }
  0x4b   : > { %572 = vrot.lane.b32.xlu0 %v548_v58, %s1188_s26 }
  0x4e   : > { %554 = vrot.lane.b32.xlu2 %v464_v53, %s1560_s16 }
  0x83   : > { %v581_v59 = vpop.permute.xlu2 %580 }
  0x94   : > { %v561_v63 = vpop.permute.xlu0 %560 }
  0x95   : > { %v596_v3 = vsel %vm584_vm6, %v524_v2, %v561_v63 }
  0x98   : > { %v583_v4 = vpop.permute.xlu2 %582 }
  0x9b   : > { %v579_v13 = vpop.permute.xlu1 %578 }
  0x9c   : > { %v563_v14 = vpop.permute.xlu0 %562  ;;  %v1428_v1 = vsel %vm603_vm7, %v596_v3, %v579_v13 }
  0x9d   : > { %v599_v5 = vsel %vm584_vm6, %v525_v0, %v563_v14  ;;  %624 = vrot.lane.b32.xlu1 %v1428_v1, %s1189_s2 }
  0x9e   : > { %v613_v16 = vsel %vm603_vm7, %v599_v5, %v581_v59 }
  0x9f   : > { %633 = vrot.lane.b32.xlu0 %v613_v16, %s1190_s28  ;;  %626 = vrot.lane.b32.xlu2 %v613_v16, %s1189_s2 }
  0xa0   : > { %v575_v22 = vpop.permute.xlu2 %574 }
  0xa4   : > { %v557_v24 = vpop.permute.xlu0 %556 }
  0xa5   : > { %v590_v25 = vsel %vm584_vm6, %v522_v19, %v557_v24 }
  0xa6   : > { %v607_v26 = vsel %vm603_vm7, %v590_v25, %v575_v22 }
  0xa7   : > { %620 = vrot.lane.b32.xlu1 %v607_v26, %s1189_s2 }
  0xa8   : > { %v555_v36 = vpop.permute.xlu2 %554 }
  0xa9   : > { %v565_v28 = vpop.permute.xlu1 %564  ;;  %v587_v11 = vsel %vm584_vm6, %v521_v10, %v555_v36 }
  0xaa   : > { %v602_v29 = vsel %vm584_vm6, %v526_v27, %v565_v28 }
  0xab   : > { %v615_v30 = vsel %vm603_vm7, %v602_v29, %v583_v4 }
  0xac   : > { %v577_v33 = vpop.permute.xlu0 %576 }
  0xaf   : > { %635 = vrot.lane.b32.xlu1 %v615_v30, %s1190_s28 }
  0xb1   : > { %v559_v34 = vpop.permute.xlu1 %558 }
  0xb2   : > { %v593_v35 = vsel %vm584_vm6, %v523_v32, %v559_v34 }
  0xb3   : > { %v609_v21 = vsel %vm603_vm7, %v593_v35, %v577_v33 }
  0xb4   : > { %629 = vrot.lane.b32.xlu0 %v609_v21, %s1190_s28  ;;  %622 = vrot.lane.b32.xlu2 %v609_v21, %s1189_s2  ;;  %s758_s2 = sadd.s32 %s973_s14, %s955_s0 }
  0xb7   : > { %631 = vrot.lane.b32.xlu1 %v1428_v1, %s1190_s28  ;;  %s956_s28 = sshll.u32 %s758_s2, 2 }
  0xb8   : > { %s760_s15 = scalar_lea.hbm %s1544_s5, %s956_s28 }
  0xb9   : > { %s763_s22 = sshll.u32 %s760_s15, 4  ;;  %s764_s22 = int_to_ptr.hbm [resolvable:$true] %s763_s22 }
  0xba   : > { %s1105_s13 = sshra.s32 %s764_s22, 4  ;;  %s1106_s13 = int_to_ptr.hbm [resolvable:$true] %s1105_s13 }
  0xbb   : > { %s1107_s8 = scalar_lea.hbm %s1106_s13, 32  ;;  %p1112_p12 = scmp.lt.s32.totalorder %s1106_s13, %s1544_s5 }
  0xbc   : > { %p1108_p9 = scmp.ne.s32.totalorder %s1106_s13, %s1107_s8  ;;  %p1113_p13 = scmp.lt.s32.totalorder %s1111_s30, %s1107_s8 }
  0xbd   : > { %v573_v42 = vpop.permute.xlu0 %572 }
  0xbe   : > { %v605_v52 = vsel %vm603_vm7, %v587_v11, %v573_v42  ;;  %p1109_p10 = pnand %p1108_p9, %p1273_p3  ;;  %p1114_p0 = por %p1113_p13, %p1112_p12 }
  0xc0   : > { %p1110_p11 = pneg %p1109_p10 }
  0xc2   : > { %p1115_p1 = pnand %p1114_p0, %p1110_p11 }
  0xf9   : > { %v627_v48 = vpop.permute.xlu2 %626 }
  0xfa   : > { %v645_v49 = vsel %vm637_vm9, %v1428_v1, %v627_v48 }
 0x10e   : > { %v623_v53 = vpop.permute.xlu2 %622 }
 0x10f   : > { %v625_v43 = vpop.permute.xlu1 %624  ;;  %v641_v57 = vsel %vm637_vm9, %v607_v26, %v623_v53 }
 0x110   : > { %v643_v44 = vsel %vm637_vm9, %v609_v21, %v625_v43 }
 0x111   : > { %v634_v45 = vpop.permute.xlu0 %633 }
 0x112   : > { %v652_v46 = vsel %vm646_vm10, %v643_v44, %v634_v45 }
 0x113   : > { %950 = vmatmul.msk.bf16.vlgmr.msra.gmra.mxu2 %vm679_vm11, %v652_v46 }
 0x119   : > { %v621_v47 = vpop.permute.xlu1 %620 }
 0x11a   : > { %v639_v54 = vsel %vm637_vm9, %v605_v52, %v621_v47 }
 0x121   : > { %v636_v50 = vpop.permute.xlu1 %635 }
 0x122   : > { %v654_v51 = vsel %vm646_vm10, %v645_v49, %v636_v50 }
 0x123   : > { %951 = vmatmul.msk.bf16.vlgmr.msra.gmra.mxu3 %vm679_vm11, %v654_v51 }
 0x126   : > { %v630_v55 = vpop.permute.xlu0 %629 }
 0x127   : > { %v648_v56 = vsel %vm646_vm10, %v639_v54, %v630_v55 }
 0x128   : > { %948 = vmatmul.msk.bf16.vlgmr.msra.gmra.mxu0 %vm679_vm11, %v648_v56 }
 0x129   : > { %v632_v58 = vpop.permute.xlu1 %631 }
 0x12a   : > { %v650_v59 = vsel %vm646_vm10, %v641_v57, %v632_v58 }
 0x12b   : > { %949 = vmatmul.msk.bf16.vlgmr.msra.gmra.mxu1 %vm679_vm11, %v650_v59 }
 0x196   : > { %v711_v60 = vpop.f32.mrf.mxu2 }
 0x197   : > { %v712_v62 = vadd.f32 %v1090_v61, %v711_v60 }
 0x199   : > { %v725_v7 = vmax.f32 %v712_v62, 0.0 }
 0x19e   : > { %v713_v63 = vpop.f32.mrf.mxu2 }
 0x19f   : > { %v714_v6 = vadd.f32 %v1090_v61, %v713_v63 }
 0x1a1   : > { %v726_v8 = vmax.f32 %v714_v6, 0.0 }
 0x1a3   : > { %v995_v9 = vpack.c.bf16 %v726_v8, %v725_v7 }
 0x1a5   : > { %1003 = vst [vmem:[%s1486_s27 + $0x10] sm:$0xff] %v995_v9   ;;  %v701_v2 = vpop.f32.mrf.mxu0 }
 0x1a6   : > { %v716_v4 = vpop.f32.mrf.mxu3  ;;  %v702_v12 = vadd.f32 %v1090_v61, %v701_v2 }
 0x1a7   : > { %v717_v0 = vadd.f32 %v1090_v61, %v716_v4 }
 0x1a8   : > { %v706_v10 = vpop.f32.mrf.mxu1  ;;  %v721_v16 = vmax.f32 %v702_v12, 0.0 }
 0x1a9   : > { %v707_v1 = vadd.f32 %v1090_v61, %v706_v10  ;;  %v727_v18 = vmax.f32 %v717_v0, 0.0 }
 0x1ab   : > { %v723_v25 = vmax.f32 %v707_v1, 0.0 }
 0x1ad   : > { %v703_v3 = vpop.f32.mrf.mxu0 }
 0x1ae   : > { %v718_v13 = vpop.f32.mrf.mxu3  ;;  %v704_v14 = vadd.f32 %v1090_v61, %v703_v3 }
 0x1af   : > { %v719_v5 = vadd.f32 %v1090_v61, %v718_v13 }
 0x1b0   : > { %v708_v17 = vpop.f32.mrf.mxu1  ;;  %v722_v19 = vmax.f32 %v704_v14, 0.0 }
 0x1b1   : > { %v728_v22 = vmax.f32 %v719_v5, 0.0  ;;  %v709_v23 = vadd.f32 %v1090_v61, %v708_v17 }
 0x1b2   : > { %v985_v24 = vpack.c.bf16 %v722_v19, %v721_v16 }
 0x1b3   : > { %v1000_v26 = vpack.c.bf16 %v728_v22, %v727_v18  ;;  %v724_v20 = vmax.f32 %v709_v23, 0.0 }
 0x1b4   : > { %986 = vst [vmem:[%s1486_s27] sm:$0xff] %v985_v24  }
 0x1b5   : > { %v990_v27 = vpack.c.bf16 %v724_v20, %v723_v25  ;;  %1004 = vst [vmem:[%s1486_s27 + $0x18] sm:$0xff] %v1000_v26  }
 0x1b7   : > { %1002 = vst [vmem:[%s1486_s27 + $0x8] sm:$0xff] %v990_v27  }
 0x1b8   : > { %1118 = shalt.err (!%p1115_p1)
}
 0x1b9   : > { %s1191_s12 = smov 64  }
 0x1ba   : > { %1014 = dma.vmem_to_hbm [thread:$0]  (%p1273_p3), %s762_s21, 512, %s764_s22, %s746_s10, %s1191_s12, %s1191_s12, %s1560_s16  }
 0x1bb PF: > { %p1020_p2 = scmp.ge.s32.totalorder %s1185_s25, 2  ;;  %s778_s27 = sand.u32 1, %s1157_s18  }
 0x1bc   : > { %s779_s2 = scalar_lea.sflag [#allocation3], %s778_s27 }
 0x1bd   : > { %p1017_p4 = pnand %p1020_p2, %p1282_p8 }
 0x1bf   : > { %p1018_p5 = pneg %p1017_p4 }
 0x1c1   : > { %1152 = dma.done.wait (%p1018_p5), %s779_s2, 512  }
 0x1c2   : > { %1154 = vsyncadd (%p1018_p5), %s779_s2, 4294966784  ;;  %s18_s25 = sadd.s32 1, %s1185_s25   ;;  %s1563_s6 = sld [smem:[#allocation5_spill]] }
 0x1c3   : > { %p15_p6 = scmp.ge.s32.totalorder %s18_s25, 10   ;;  %s1564_s16 = sld [smem:[#allocation6_spill]] }
 0x1c4   : > { %s1565_s18 = smov %s1161_s19  ;;  %s1566_s19 = smov %s1165_s20 }
 0x1c5   : > { %s1567_s20 = smov %s1291_s11  ;;  %s1568_s21 = smov %s1177_s23 }
 0x1c6   : > { %s1569_s22 = smov %s1181_s24  ;;  %17 = sbr.rel (!%p15_p6) target bundleno = 8 (0x8), region = 81 }
 0x1c8   : > { %s1570_s23 = smov %s1563_s6 }
 0x1c9   : > { %s1571_s24 = smov %s1564_s16 }
 0x1cb   :  { %785 = vsyncpa [#allocation3], 1 }
 0x1cc   :  { %787 = vsyncpa [#allocation3 + $0x1], 1 }

</bundles_post_ra>
